<compile_context>
chip_gen: v7x
topology: tpu7x:2x2x1
jax: 0.10.0
libtpu: 0.0.40
codegen_flags: <defaults>
</compile_context>

<pallas_src>
import numpy as np
import jax
import jax.numpy as jnp
from jax.experimental import pallas as pl
from jax.experimental.pallas import tpu as pltpu

NUM_GAUSSIANS = 6
RANDOM_VAR_DIM = 69   # SMPL body-pose dimension (means.shape[1] in the real prior)
DPAD = 128            # padded pose dimension (lane width); lane DPAD-1 is the "1" lane


def _gmm_nll_kernel(pose_ref, pall_ref, out_ref, paug_ref):
    """out[b] = min_m 0.5 * pose_aug[b] @ P'_m @ pose_aug[b]  for one batch tile."""
    tb, d = pose_ref.shape
    num_g = pall_ref.shape[1] // DPAD

    # Build the augmented pose tile [tb, 128] in VMEM scratch:
    #   lanes 0..d-1 = pose, lanes d..126 = 0, lane 127 = 1.
    # Rebuilt every grid step (cheap VMEM-only stores) -> correct under megacore sharding.
    paug_ref[...] = jnp.zeros_like(paug_ref)
    paug_ref[:, :d] = pose_ref[...]
    paug_ref[:, DPAD - 1:DPAD] = jnp.ones((tb, 1), jnp.float32)
    pose = paug_ref[...]                                   # [tb, 128], lane 127 == 1.0

    # One fused MXU contraction against all Gaussians at once.
    v = jnp.dot(pose, pall_ref[...], preferred_element_type=jnp.float32)   # [tb, num_g*128]

    # Per-Gaussian epilogue on 128-lane-aligned static slices; running min on [tb,1] (VPU).
    min_ll = None
    for m in range(num_g):                                 # small static M -> unrolled
        vm = v[:, m * DPAD:(m + 1) * DPAD]                 # [tb, 128]
        ll_m = 0.5 * jnp.sum(vm * pose, axis=-1, keepdims=True)   # [tb, 1]
        min_ll = ll_m if min_ll is None else jnp.minimum(min_ll, ll_m)
    out_ref[...] = min_ll


def build_prior_params(means, precisions, nll_weights, dpad=DPAD):
    """Prior-build-time folding: returns the fused augmented precisions [dpad, M*dpad] (f32)."""
    means = jnp.asarray(means, jnp.float32)
    precisions = jnp.asarray(precisions, jnp.float32)
    nll_weights = jnp.asarray(nll_weights, jnp.float32)
    M, D = means.shape
    assert D < dpad, "need at least one spare lane for the augmentation constant"

    prec_sym = 0.5 * (precisions + jnp.transpose(precisions, (0, 2, 1)))   # [M,D,D]
    pmu = jnp.einsum('mij,mj->mi', prec_sym, means)                        # [M,D]
    mupmu = jnp.einsum('mi,mi->m', pmu, means)                             # [M]
    logw = jnp.log(nll_weights.reshape(M))                                 # [M]
    const = mupmu - 2.0 * logw                                             # [M]

    paug = jnp.zeros((M, dpad, dpad), jnp.float32)
    paug = paug.at[:, :D, :D].set(prec_sym)
    paug = paug.at[:, dpad - 1, :D].set(-pmu)
    paug = paug.at[:, :D, dpad - 1].set(-pmu)
    paug = paug.at[:, dpad - 1, dpad - 1].set(const)

    # Fuse along columns -> one wide MXU operand: pall[k, m*dpad + j] = P'_m[k, j].
    pall = jnp.transpose(paug, (1, 0, 2)).reshape(dpad, M * dpad)
    return pall


def _round_up(x, k):
    return ((x + k - 1) // k) * k


def _cdiv(a, b):
    return -(-a // b)


def max_mixture_prior_forward(pose, betas, prior_params, *, block_b=512):
    """MaxMixturePrior.forward(pose, betas) with use_merged=True.

    `prior_params` is the [128, M*128] tensor from build_prior_params (init-time work).
    """
    del betas  # unused by merged_log_likelihood (matches the PyTorch module)
    pose = jnp.asarray(pose, jnp.float32)
    B, D = pose.shape
    dpad, mtot = prior_params.shape
    assert dpad == DPAD and mtot % DPAD == 0

    # Batch tile: multiple of 8 sublanes, capped at block_b.
    tb = _round_up(min(block_b, _round_up(B, 8)), 8)
    # Keep >= 2 grid steps when the batch allows it (v7x megacore: 2 TensorCores).
    if B > 8 and _cdiv(B, tb) < 2:
        tb = _round_up(_cdiv(B, 2), 8)
    ngrid = _cdiv(B, tb)
    bpad = ngrid * tb   # output is padded to a whole number of tiles; sliced to [:B] below

    out = pl.pallas_call(
        _gmm_nll_kernel,
        out_shape=jax.ShapeDtypeStruct((bpad, 1), jnp.float32),
        grid=(ngrid,),
        in_specs=[
            # Raw pose, full last dim (=69): no wrapper-side padded copy in HBM.
            pl.BlockSpec((tb, D), lambda i: (i, 0)),
            # Fused prior operand, resident across the grid.
            pl.BlockSpec((DPAD, mtot), lambda i: (0, 0)),
        ],
        out_specs=pl.BlockSpec((tb, 1), lambda i: (i, 0)),
        scratch_shapes=[pltpu.VMEM((tb, DPAD), jnp.float32)],   # augmented pose tile
        compiler_params=pltpu.CompilerParams(
            dimension_semantics=("parallel",)),                 # megacore-shardable on v7x
    )(pose, prior_params)
    return out[:B, 0]  # [B]


def build_synthetic_prior(key, num_gaussians=NUM_GAUSSIANS, dim=RANDOM_VAR_DIM):
    """Deterministic synthetic GMM parameters (stands in for the pickled prior)."""
    k1, k2, k3 = jax.random.split(key, 3)
    means = jax.random.normal(k1, (num_gaussians, dim), dtype=jnp.float32) * 0.1

    # SPD covariances: cov = A A^T / dim + 0.5 I
    A = jax.random.normal(k2, (num_gaussians, dim, dim), dtype=jnp.float32) * 0.1
    covs = jnp.einsum('mij,mkj->mik', A, A) / dim + 0.5 * jnp.eye(dim, dtype=jnp.float32)

    # mixture weights
    w_logits = jax.random.normal(k3, (num_gaussians,), dtype=jnp.float32)
    weights = jax.nn.softmax(w_logits)

    # precisions, sqrt-dets, nll_weights (float64 numpy, like the module's __init__)
    covs_np = np.asarray(covs, dtype=np.float64)
    precisions = np.stack([np.linalg.inv(c) for c in covs_np]).astype(np.float32)
    sqrdets = np.array([np.sqrt(np.linalg.det(c)) for c in covs_np])
    const = (2 * np.pi) ** (dim / 2.0)
    nll_weights = np.asarray(np.asarray(weights, dtype=np.float64)
                             / (const * (sqrdets / sqrdets.min())))
    nll_weights = nll_weights.astype(np.float32)[None, :]  # [1, M]

    return (means.astype(jnp.float32),
            jnp.asarray(precisions),
            jnp.asarray(nll_weights))


def reference_forward(pose, means, precisions, nll_weights):
    """Pure-JAX reference of merged_log_likelihood for correctness check."""
    diff = pose[:, None, :] - means[None, :, :]                       # [B,M,D]
    v = jnp.einsum('mij,bmj->bmi', precisions, diff)                  # [B,M,D]
    quad = jnp.sum(v * diff, axis=-1)                                 # [B,M]
    ll = 0.5 * quad - jnp.log(nll_weights)                            # [B,M]
    return jnp.min(ll, axis=1)                                        # [B]


if __name__ == "__main__":
    key = jax.random.PRNGKey(0)
    kp, kb, kp2, kprior = jax.random.split(key, 4)

    means, precisions, nll_weights = build_synthetic_prior(kprior)
    # prior-build-time folding (would live in __init__ of the module)
    prior_params = build_prior_params(means, precisions, nll_weights)

    # --- small test: single tile ---
    B = 8
    pose = jax.random.normal(kp, (B, RANDOM_VAR_DIM), dtype=jnp.float32) * 0.2
    betas = jax.random.normal(kb, (B, 10), dtype=jnp.float32)  # unused (as in the module)

    out = max_mixture_prior_forward(pose, betas, prior_params)
    out = jax.block_until_ready(out)
    ref = reference_forward(pose, means, precisions, nll_weights)
    np.testing.assert_allclose(np.asarray(out), np.asarray(ref), rtol=1e-4, atol=1e-4)

    # --- small test: multi-tile grid with a ragged last batch tile ---
    B2 = 20
    pose2 = jax.random.normal(kp2, (B2, RANDOM_VAR_DIM), dtype=jnp.float32) * 0.2
    out2 = max_mixture_prior_forward(pose2, None, prior_params, block_b=8)
    out2 = jax.block_until_ready(out2)
    ref2 = reference_forward(pose2, means, precisions, nll_weights)
    np.testing.assert_allclose(np.asarray(out2), np.asarray(ref2), rtol=1e-4, atol=1e-4)

    print("KERNEL_OK")
</pallas_src>

<mosaic_0001>
module attributes {stable_mosaic.version = 11 : i64} {
  func.func @_gmm_nll_kernel(%arg0: i32, %arg1: memref<8x69xf32, #tpu.memory_space<vmem>>, %arg2: memref<128x768xf32, #tpu.memory_space<vmem>>, %arg3: memref<8x1xf32, #tpu.memory_space<vmem>>, %arg4: memref<8x128xf32, #tpu.memory_space<vmem>>) attributes {dimension_semantics = [#tpu.dimension_semantics<parallel>], iteration_bounds = array<i64: 1>, scalar_prefetch = 0 : i64, scratch_operands = 1 : i64, tpu.core_type = #tpu.core_type<tc>, window_params = [{transform_indices = @transform_0, window_bounds = array<i64: 8, 69>}, {pipeline_mode = #tpu.pipeline_mode<synchronous>, transform_indices = @transform_1, window_bounds = array<i64: 128, 768>}, {transform_indices = @transform_2, window_bounds = array<i64: 8, 1>}]} {
    %cst = arith.constant 0.000000e+00 : f32
    %0 = vector.broadcast %cst : f32 to vector<8x128xf32>
    %c0 = arith.constant 0 : index
    %c0_0 = arith.constant 0 : index
    %1 = vector.load %arg4[%c0, %c0_0] : memref<8x128xf32, #tpu.memory_space<vmem>>, vector<8x128xf32>
    tpu.vector_store %arg4[%c0, %c0_0], %0 {strides = array<i32>} : memref<8x128xf32, #tpu.memory_space<vmem>>, vector<8x128xf32>,
    %c0_1 = arith.constant 0 : index
    %c0_2 = arith.constant 0 : index
    %2 = vector.load %arg1[%c0_1, %c0_2] : memref<8x69xf32, #tpu.memory_space<vmem>>, vector<8x69xf32>
    %c0_3 = arith.constant 0 : index
    %c0_4 = arith.constant 0 : index
    %3 = vector.load %arg4[%c0_3, %c0_4] : memref<8x128xf32, #tpu.memory_space<vmem>>, vector<8x69xf32>
    tpu.vector_store %arg4[%c0_3, %c0_4], %2 {strides = array<i32>} : memref<8x128xf32, #tpu.memory_space<vmem>>, vector<8x69xf32>,
    %cst_5 = arith.constant 1.000000e+00 : f32
    %4 = vector.broadcast %cst_5 : f32 to vector<8x1xf32>
    %c0_6 = arith.constant 0 : index
    %c127 = arith.constant 127 : index
    %5 = vector.load %arg4[%c0_6, %c127] : memref<8x128xf32, #tpu.memory_space<vmem>>, vector<8x1xf32>
    tpu.vector_store %arg4[%c0_6, %c127], %4 {strides = array<i32>} : memref<8x128xf32, #tpu.memory_space<vmem>>, vector<8x1xf32>,
    %c0_7 = arith.constant 0 : index
    %c0_8 = arith.constant 0 : index
    %6 = vector.load %arg4[%c0_7, %c0_8] : memref<8x128xf32, #tpu.memory_space<vmem>>, vector<8x128xf32>
    %c0_9 = arith.constant 0 : index
    %c0_10 = arith.constant 0 : index
    %7 = vector.load %arg2[%c0_9, %c0_10] : memref<128x768xf32, #tpu.memory_space<vmem>>, vector<128x768xf32>
    %cst_11 = arith.constant dense<0.000000e+00> : vector<8x768xf32>
    %8 = tpu.matmul %6, %7, %cst_11 {dimension_numbers = #tpu.dot_dimension_numbers<[1], [0], [0], [1], [0, 0, 1, 1], [], []>} : vector<8x128xf32>, vector<128x768xf32>, vector<8x768xf32> -> vector<8x768xf32>
    %9 = vector.extract_strided_slice %8 {offsets = [0, 0], sizes = [8, 128], strides = [1, 1]} : vector<8x768xf32> to vector<8x128xf32>
    %10 = arith.mulf %9, %6 : vector<8x128xf32>
    %cst_12 = arith.constant dense<0.000000e+00> : vector<8xf32>
    %11 = vector.multi_reduction <add>, %10, %cst_12 [1] : vector<8x128xf32> to vector<8xf32>
    %12 = vector.shape_cast %11 : vector<8xf32> to vector<8x1xf32>
    %cst_13 = arith.constant 5.000000e-01 : f32
    %13 = vector.broadcast %cst_13 : f32 to vector<8x1xf32>
    %14 = arith.mulf %13, %12 : vector<8x1xf32>
    %15 = vector.extract_strided_slice %8 {offsets = [0, 128], sizes = [8, 128], strides = [1, 1]} : vector<8x768xf32> to vector<8x128xf32>
    %16 = arith.mulf %15, %6 : vector<8x128xf32>
    %cst_14 = arith.constant dense<0.000000e+00> : vector<8xf32>
    %17 = vector.multi_reduction <add>, %16, %cst_14 [1] : vector<8x128xf32> to vector<8xf32>
    %18 = vector.shape_cast %17 : vector<8xf32> to vector<8x1xf32>
    %cst_15 = arith.constant 5.000000e-01 : f32
    %19 = vector.broadcast %cst_15 : f32 to vector<8x1xf32>
    %20 = arith.mulf %19, %18 : vector<8x1xf32>
    %21 = arith.minimumf %14, %20 : vector<8x1xf32>
    %22 = vector.extract_strided_slice %8 {offsets = [0, 256], sizes = [8, 128], strides = [1, 1]} : vector<8x768xf32> to vector<8x128xf32>
    %23 = arith.mulf %22, %6 : vector<8x128xf32>
    %cst_16 = arith.constant dense<0.000000e+00> : vector<8xf32>
    %24 = vector.multi_reduction <add>, %23, %cst_16 [1] : vector<8x128xf32> to vector<8xf32>
    %25 = vector.shape_cast %24 : vector<8xf32> to vector<8x1xf32>
    %cst_17 = arith.constant 5.000000e-01 : f32
    %26 = vector.broadcast %cst_17 : f32 to vector<8x1xf32>
    %27 = arith.mulf %26, %25 : vector<8x1xf32>
    %28 = arith.minimumf %21, %27 : vector<8x1xf32>
    %29 = vector.extract_strided_slice %8 {offsets = [0, 384], sizes = [8, 128], strides = [1, 1]} : vector<8x768xf32> to vector<8x128xf32>
    %30 = arith.mulf %29, %6 : vector<8x128xf32>
    %cst_18 = arith.constant dense<0.000000e+00> : vector<8xf32>
    %31 = vector.multi_reduction <add>, %30, %cst_18 [1] : vector<8x128xf32> to vector<8xf32>
    %32 = vector.shape_cast %31 : vector<8xf32> to vector<8x1xf32>
    %cst_19 = arith.constant 5.000000e-01 : f32
    %33 = vector.broadcast %cst_19 : f32 to vector<8x1xf32>
    %34 = arith.mulf %33, %32 : vector<8x1xf32>
    %35 = arith.minimumf %28, %34 : vector<8x1xf32>
    %36 = vector.extract_strided_slice %8 {offsets = [0, 512], sizes = [8, 128], strides = [1, 1]} : vector<8x768xf32> to vector<8x128xf32>
    %37 = arith.mulf %36, %6 : vector<8x128xf32>
    %cst_20 = arith.constant dense<0.000000e+00> : vector<8xf32>
    %38 = vector.multi_reduction <add>, %37, %cst_20 [1] : vector<8x128xf32> to vector<8xf32>
    %39 = vector.shape_cast %38 : vector<8xf32> to vector<8x1xf32>
    %cst_21 = arith.constant 5.000000e-01 : f32
    %40 = vector.broadcast %cst_21 : f32 to vector<8x1xf32>
    %41 = arith.mulf %40, %39 : vector<8x1xf32>
    %42 = arith.minimumf %35, %41 : vector<8x1xf32>
    %43 = vector.extract_strided_slice %8 {offsets = [0, 640], sizes = [8, 128], strides = [1, 1]} : vector<8x768xf32> to vector<8x128xf32>
    %44 = arith.mulf %43, %6 : vector<8x128xf32>
    %cst_22 = arith.constant dense<0.000000e+00> : vector<8xf32>
    %45 = vector.multi_reduction <add>, %44, %cst_22 [1] : vector<8x128xf32> to vector<8xf32>
    %46 = vector.shape_cast %45 : vector<8xf32> to vector<8x1xf32>
    %cst_23 = arith.constant 5.000000e-01 : f32
    %47 = vector.broadcast %cst_23 : f32 to vector<8x1xf32>
    %48 = arith.mulf %47, %46 : vector<8x1xf32>
    %49 = arith.minimumf %42, %48 : vector<8x1xf32>
    %c0_24 = arith.constant 0 : index
    %c0_25 = arith.constant 0 : index
    %50 = vector.load %arg3[%c0_24, %c0_25] : memref<8x1xf32, #tpu.memory_space<vmem>>, vector<8x1xf32>
    tpu.vector_store %arg3[%c0_24, %c0_25], %49 {strides = array<i32>} : memref<8x1xf32, #tpu.memory_space<vmem>>, vector<8x1xf32>,
    return
  }
  func.func @transform_0(%arg0: i32) -> (i32, i32) {
    %c0_i32 = arith.constant 0 : i32
    %c0_i32_0 = arith.constant 0 : i32
    return %arg0, %c0_i32 : i32, i32
  }
  func.func @transform_1(%arg0: i32) -> (i32, i32) {
    %c0_i32 = arith.constant 0 : i32
    %c0_i32_0 = arith.constant 0 : i32
    %c0_i32_1 = arith.constant 0 : i32
    return %c0_i32, %c0_i32_0 : i32, i32
  }
  func.func @transform_2(%arg0: i32) -> (i32, i32) {
    %c0_i32 = arith.constant 0 : i32
    %c0_i32_0 = arith.constant 0 : i32
    return %arg0, %c0_i32 : i32, i32
  }
}

</mosaic_0001>

<bundles_post_ra>
// kernel: tpu_custom_call.1
= control target key start
LH: loop header
LB: loop body
LE: loop exit
PB: predicated region body
PF: predicated region fallthrough
CT: control target
= control target key end

     0   :  { %7 = vsyncpa [#allocation4], 0  ;;  %s611_s0 = inlined_call_operand.hbm [shape: f32[8,69], index: 0, kind: input, shape index: {}]   ;;  %s612_s1 = inlined_call_operand.hbm [shape: f32[128,768], index: 1, kind: input, shape index: {}]   ;;  %s613_s2 = inlined_call_operand.vmem [shape: f32[8,1], index: 2, kind: output, shape index: {}]  }
   0x1   :  { %8 = vsyncpa [#allocation6], 0  ;;  %s540_s9 = smov [#allocation3]   ;;  %s541_s11 = smov [#allocation5]  }
   0x2   :  { %s15_s10 = sshll.u32 %s540_s9, 4  ;;  %s24_s12 = sshll.u32 %s541_s11, 4  ;;  %s16_s10 = int_to_ptr.vmem [resolvable:$true] %s15_s10  ;;  %s561_s12 = int_to_ptr.vmem [resolvable:$true] %s24_s12 }
   0x3   :  { %s492_s15 = scalar_lea.hbm %s611_s0, 128 }
   0x4   :  { %p493_p0 = scmp.ne.s32.totalorder %s611_s0, %s492_s15  ;;  %p496_p1 = scmp.lt.u32.totalorder %s492_s15, %s611_s0 }
   0x6   :  { %p498_p2 = pnand %p496_p1, %p493_p0 }
   0x8   :  { %501 = shalt.err (!%p498_p2)
}
   0x9   :  { %s502_s20 = scalar_lea.vmem %s16_s10, 128  ;;  %p507_p4 = scmp.lt.s32.totalorder %s16_s10, %s16_s10 }
   0xa   :  { %p503_p3 = scmp.ne.s32.totalorder %s16_s10, %s502_s20  ;;  %p508_p5 = scmp.lt.s32.totalorder %s502_s20, %s502_s20 }
   0xc   :  { %p509_p6 = por %p508_p5, %p507_p4 }
   0xe   :  { %p510_p7 = pnand %p509_p6, %p503_p3 }
  0x10   :  { %513 = shalt.err (!%p510_p7)
}
  0x11   :  { %18 = dma.hbm_to_vmem [thread:$0]  %s611_s0, 128, %s16_s10, [#allocation4]  }
  0x12   :  { %s514_s25 = scalar_lea.hbm %s612_s1, 12288 }
  0x13   :  { %p515_p8 = scmp.ne.s32.totalorder %s612_s1, %s514_s25  ;;  %p518_p9 = scmp.lt.u32.totalorder %s514_s25, %s612_s1 }
  0x15   :  { %p520_p10 = pnand %p518_p9, %p515_p8 }
  0x17   :  { %523 = shalt.err (!%p520_p10)
}
  0x18   :  { %s524_s30 = scalar_lea.vmem %s561_s12, 12288  ;;  %p529_p12 = scmp.lt.s32.totalorder %s561_s12, %s561_s12 }
  0x19   :  { %p525_p11 = scmp.ne.s32.totalorder %s561_s12, %s524_s30  ;;  %p530_p13 = scmp.lt.s32.totalorder %s524_s30, %s524_s30 }
  0x1b   :  { %p531_p0 = por %p530_p13, %p529_p12 }
  0x1d   :  { %p532_p1 = pnand %p531_p0, %p525_p11 }
  0x1f   :  { %535 = shalt.err (!%p532_p1)
}
  0x20   :  { %s542_s0 = smov 768   ;;  %s543_s3 = smov 48  }
  0x21   :  { %30 = dma.hbm_to_vmem [thread:$0]  %s612_s1, 12288, %s561_s12, [#allocation6], %s542_s0, %s542_s0, %s543_s3  }
  0x22   :  { %536 = dma.done.wait [#allocation4], 128  }
  0x23   :  { %537 = vsyncadd [#allocation4], 4294967168 }
  0x24   :  { %538 = dma.done.wait [#allocation6], 12288  }
  0x25   :  { %539 = vsyncadd [#allocation6], 4294955008  ;;  %v544_v0 = vmov 0.0   ;;  %v45_v1 = vld [vmem:[#allocation5 + $0x8] sm:$0xff]  ;;  %v51_v2 = vld [vmem:[#allocation5 + $0x38] sm:$0xff]  ;;  %vm39_vm0 = vcmask 564224  }
  0x26   :  { %37 = vst [vmem:[#allocation2] sm:$0xff] %v544_v0  ;;  %204 = vmatprep.mubr.f32.mxu0 %v544_v0  ;;  %275 = vmatprep.mubr.f32.mxu1 %v544_v0  ;;  %v44_v3 = vld [vmem:[#allocation5] sm:$0xff]  ;;  %v390_v4 = vpack.c.bf16 %v51_v2, %v45_v1  ;;  %v50_v5 = vld [vmem:[#allocation5 + $0x30] sm:$0xff]  ;;  %v57_v6 = vld [vmem:[#allocation5 + $0x68] sm:$0xff]  ;;  %vm41_vm1 = vcmask 1048568   ;;  %vm382_vm2 = vcmask 7168  }
  0x27   :  { %v63_v7 = vld [vmem:[#allocation5 + $0x98] sm:$0xff]  ;;  %v392_v8 = vpack.c.bf16 %v50_v5, %v44_v3  ;;  %v53_v11 = vld [vmem:[#allocation5 + $0x48] sm:$0xff]  ;;  %v56_v12 = vld [vmem:[#allocation5 + $0x60] sm:$0xff] }
  0x28   :  { %v394_v9 = vpack.c.bf16 %v63_v7, %v57_v6  ;;  %v47_v10 = vld [vmem:[#allocation5 + $0x18] sm:$0xff]  ;;  %391 = vmatprep.subr.bf16.mxu0 %v390_v4  ;;  %v62_v14 = vld [vmem:[#allocation5 + $0x90] sm:$0xff]  ;;  %v52_v16 = vld [vmem:[#allocation5 + $0x40] sm:$0xff] }
  0x29   :  { %v422_v13 = vpack.c.bf16 %v53_v11, %v47_v10  ;;  %v46_v15 = vld [vmem:[#allocation5 + $0x10] sm:$0xff]  ;;  %393 = vmatpush1.bf16.msra.mxu0 %v392_v8  ;;  %v396_v17 = vpack.c.bf16 %v62_v14, %v56_v12  ;;  %v69_v19 = vld [vmem:[#allocation5 + $0xc8] sm:$0xff]  ;;  %v75_v20 = vld [vmem:[#allocation5 + $0xf8] sm:$0xff] }
  0x2a   :  { %v424_v18 = vpack.c.bf16 %v52_v16, %v46_v15  ;;  %v59_v21 = vld [vmem:[#allocation5 + $0x78] sm:$0xff]  ;;  %395 = vmatprep.subr.bf16.mxu0 %v394_v9  ;;  %v398_v22 = vpack.c.bf16 %v75_v20, %v69_v19  ;;  %v65_v23 = vld [vmem:[#allocation5 + $0xa8] sm:$0xff]  ;;  %v68_v24 = vld [vmem:[#allocation5 + $0xc0] sm:$0xff]  ;;  %v545_v20 = vmov 1.0  }
  0x2b   :  { %423 = vmatprep.subr.bf16.mxu1 %v422_v13  ;;  %v74_v25 = vld [vmem:[#allocation5 + $0xf0] sm:$0xff]  ;;  %v426_v26 = vpack.c.bf16 %v65_v23, %v59_v21  ;;  %v64_v28 = vld [vmem:[#allocation5 + $0xa0] sm:$0xff]  ;;  %v81_v29 = vld [vmem:[#allocation5 + $0x128] sm:$0xff] }
  0x2c   :  { %425 = vmatpush1.bf16.msra.mxu1 %v424_v18  ;;  %v58_v27 = vld [vmem:[#allocation5 + $0x70] sm:$0xff]  ;;  %v87_v31 = vld [vmem:[#allocation5 + $0x158] sm:$0xff]  ;;  %v77_v33 = vld [vmem:[#allocation5 + $0x108] sm:$0xff]  ;;  %v400_v34 = vpack.c.bf16 %v74_v25, %v68_v24 }
  0x2d   :  { %v428_v30 = vpack.c.bf16 %v64_v28, %v58_v27  ;;  %v71_v32 = vld [vmem:[#allocation5 + $0xd8] sm:$0xff]  ;;  %397 = vmatpush1.bf16.msra.mxu0 %v396_v17  ;;  %427 = vmatprep.subr.bf16.mxu1 %v426_v26  ;;  %v80_v36 = vld [vmem:[#allocation5 + $0x120] sm:$0xff]  ;;  %v70_v37 = vld [vmem:[#allocation5 + $0xd0] sm:$0xff]  ;;  %v402_v38 = vpack.c.bf16 %v87_v31, %v81_v29 }
  0x2e   :  { %v430_v35 = vpack.c.bf16 %v77_v33, %v71_v32  ;;  %399 = vmatprep.subr.bf16.mxu0 %v398_v22  ;;  %v86_v39 = vld [vmem:[#allocation5 + $0x150] sm:$0xff]  ;;  %v76_v40 = vld [vmem:[#allocation5 + $0x100] sm:$0xff]  ;;  %v93_v41 = vld [vmem:[#allocation5 + $0x188] sm:$0xff] }
  0x2f   :  { %v432_v42 = vpack.c.bf16 %v76_v40, %v70_v37  ;;  %v99_v43 = vld [vmem:[#allocation5 + $0x1b8] sm:$0xff]  ;;  %v89_v45 = vld [vmem:[#allocation5 + $0x168] sm:$0xff]  ;;  %v82_v47 = vld [vmem:[#allocation5 + $0x130] sm:$0xff]  ;;  %v404_v49 = vpack.c.bf16 %v86_v39, %v80_v36 }
  0x30   :  { %429 = vmatpush1.bf16.msra.mxu1 %v428_v30  ;;  %v83_v44 = vld [vmem:[#allocation5 + $0x138] sm:$0xff]  ;;  %v88_v48 = vld [vmem:[#allocation5 + $0x160] sm:$0xff]  ;;  %v406_v51 = vpack.c.bf16 %v99_v43, %v93_v41  ;;  %v98_v53 = vld [vmem:[#allocation5 + $0x1b0] sm:$0xff] }
  0x31   :  { %431 = vmatprep.subr.bf16.mxu1 %v430_v35  ;;  %v434_v46 = vpack.c.bf16 %v89_v45, %v83_v44  ;;  %401 = vmatpush1.bf16.msra.mxu0 %v400_v34  ;;  %v95_v50 = vld [vmem:[#allocation5 + $0x198] sm:$0xff]  ;;  %v92_v52 = vld [vmem:[#allocation5 + $0x180] sm:$0xff]  ;;  %v101_v54 = vld [vmem:[#allocation5 + $0x1c8] sm:$0xff]  ;;  %v436_v55 = vpack.c.bf16 %v88_v48, %v82_v47 }
  0x32   :  { %403 = vmatprep.subr.bf16.mxu0 %v402_v38  ;;  %v105_v56 = vld [vmem:[#allocation5 + $0x1e8] sm:$0xff]  ;;  %v111_v57 = vld [vmem:[#allocation5 + $0x218] sm:$0xff]  ;;  %v438_v58 = vpack.c.bf16 %v101_v54, %v95_v50  ;;  %v94_v59 = vld [vmem:[#allocation5 + $0x190] sm:$0xff]  ;;  %v408_v61 = vpack.c.bf16 %v98_v53, %v92_v52 }
  0x33   :  { %v100_v60 = vld [vmem:[#allocation5 + $0x1c0] sm:$0xff]  ;;  %v107_v62 = vld [vmem:[#allocation5 + $0x1f8] sm:$0xff]  ;;  %v113_v63 = vld [vmem:[#allocation5 + $0x228] sm:$0xff]  ;;  %v410_v1 = vpack.c.bf16 %v111_v57, %v105_v56 }
  0x34   :  { %433 = vmatpush1.bf16.msra.mxu1 %v432_v42  ;;  %v104_v2 = vld [vmem:[#allocation5 + $0x1e0] sm:$0xff]  ;;  %v110_v3 = vld [vmem:[#allocation5 + $0x210] sm:$0xff]  ;;  %v440_v4 = vpack.c.bf16 %v100_v60, %v94_v59  ;;  %v117_v5 = vld [vmem:[#allocation5 + $0x248] sm:$0xff]  ;;  %v442_v7 = vpack.c.bf16 %v113_v63, %v107_v62 }
  0x35   :  { %435 = vmatprep.subr.bf16.mxu1 %v434_v46  ;;  %405 = vmatpush1.bf16.msra.mxu0 %v404_v49  ;;  %v123_v6 = vld [vmem:[#allocation5 + $0x278] sm:$0xff]  ;;  %v106_v8 = vld [vmem:[#allocation5 + $0x1f0] sm:$0xff]  ;;  %v112_v9 = vld [vmem:[#allocation5 + $0x220] sm:$0xff]  ;;  %v412_v10 = vpack.c.bf16 %v110_v3, %v104_v2 }
  0x36   :  { %407 = vmatprep.subr.bf16.mxu0 %v406_v51  ;;  %v119_v11 = vld [vmem:[#allocation5 + $0x258] sm:$0xff]  ;;  %v125_v12 = vld [vmem:[#allocation5 + $0x288] sm:$0xff]  ;;  %v414_v14 = vpack.c.bf16 %v123_v6, %v117_v5  ;;  %v116_v15 = vld [vmem:[#allocation5 + $0x240] sm:$0xff]  ;;  %v444_v17 = vpack.c.bf16 %v112_v9, %v106_v8 }
  0x37   :  { %v38_v13 = vld [vmem:[#allocation3] sm:$0xff]  ;;  %v122_v16 = vld [vmem:[#allocation5 + $0x270] sm:$0xff]  ;;  %v129_v18 = vld [vmem:[#allocation5 + $0x2a8] sm:$0xff]  ;;  %v446_v21 = vpack.c.bf16 %v125_v12, %v119_v11 }
  0x38   :  { %437 = vmatpush1.bf16.msra.mxu1 %v436_v55  ;;  %40 = vst.msk [vmem:[#allocation2] sm:$0xff] %vm39_vm0, %v38_v13  ;;  %v135_v19 = vld [vmem:[#allocation5 + $0x2d8] sm:$0xff]  ;;  %v118_v22 = vld [vmem:[#allocation5 + $0x250] sm:$0xff]  ;;  %v124_v23 = vld [vmem:[#allocation5 + $0x280] sm:$0xff]  ;;  %v416_v24 = vpack.c.bf16 %v122_v16, %v116_v15 }
  0x39   :  { %439 = vmatprep.subr.bf16.mxu1 %v438_v58  ;;  %409 = vmatpush1.bf16.msra.mxu0 %v408_v61  ;;  %42 = vst.msk [vmem:[#allocation2] sm:$0xff] %vm41_vm1, %v545_v20  ;;  %v131_v25 = vld [vmem:[#allocation5 + $0x2b8] sm:$0xff]  ;;  %v137_v26 = vld [vmem:[#allocation5 + $0x2e8] sm:$0xff]  ;;  %v418_v27 = vpack.c.bf16 %v135_v19, %v129_v18  ;;  %v128_v28 = vld [vmem:[#allocation5 + $0x2a0] sm:$0xff]  ;;  %v448_v30 = vpack.c.bf16 %v124_v23, %v118_v22 }
  0x3a   :  { %411 = vmatprep.subr.bf16.mxu0 %v410_v1  ;;  %v134_v29 = vld [vmem:[#allocation5 + $0x2d0] sm:$0xff]  ;;  %v49_v31 = vld [vmem:[#allocation5 + $0x28] sm:$0xff]  ;;  %v55_v32 = vld [vmem:[#allocation5 + $0x58] sm:$0xff]  ;;  %v450_v33 = vpack.c.bf16 %v137_v26, %v131_v25 }
  0x3b   :  { %v130_v34 = vld [vmem:[#allocation5 + $0x2b0] sm:$0xff]  ;;  %v136_v35 = vld [vmem:[#allocation5 + $0x2e0] sm:$0xff]  ;;  %v420_v36 = vpack.c.bf16 %v134_v29, %v128_v28  ;;  %v454_v37 = vpack.c.bf16 %v55_v32, %v49_v31  ;;  %v61_v41 = vld [vmem:[#allocation5 + $0x88] sm:$0xff] }
  0x3c   :  { %441 = vmatpush1.bf16.msra.mxu1 %v440_v4  ;;  %v48_v38 = vld [vmem:[#allocation5 + $0x20] sm:$0xff]  ;;  %v54_v39 = vld [vmem:[#allocation5 + $0x50] sm:$0xff]  ;;  %v452_v40 = vpack.c.bf16 %v136_v35, %v130_v34  ;;  %v67_v42 = vld [vmem:[#allocation5 + $0xb8] sm:$0xff] }
  0x3d   :  { %443 = vmatprep.subr.bf16.mxu1 %v442_v7  ;;  %413 = vmatpush1.bf16.msra.mxu0 %v412_v10  ;;  %v456_v44 = vpack.c.bf16 %v54_v39, %v48_v38  ;;  %v458_v45 = vpack.c.bf16 %v67_v42, %v61_v41  ;;  %v60_v46 = vld [vmem:[#allocation5 + $0x80] sm:$0xff]  ;;  %v66_v47 = vld [vmem:[#allocation5 + $0xb0] sm:$0xff]  ;;  %v73_v48 = vld [vmem:[#allocation5 + $0xe8] sm:$0xff] }
  0x3e   :  { %415 = vmatprep.subr.bf16.mxu0 %v414_v14  ;;  %v79_v49 = vld [vmem:[#allocation5 + $0x118] sm:$0xff]  ;;  %v460_v50 = vpack.c.bf16 %v66_v47, %v60_v46  ;;  %v72_v52 = vld [vmem:[#allocation5 + $0xe0] sm:$0xff]  ;;  %v78_v53 = vld [vmem:[#allocation5 + $0x110] sm:$0xff] }
  0x3f   :  { %v462_v51 = vpack.c.bf16 %v79_v49, %v73_v48  ;;  %v85_v54 = vld [vmem:[#allocation5 + $0x148] sm:$0xff]  ;;  %v91_v55 = vld [vmem:[#allocation5 + $0x178] sm:$0xff]  ;;  %v464_v56 = vpack.c.bf16 %v78_v53, %v72_v52  ;;  %v84_v58 = vld [vmem:[#allocation5 + $0x140] sm:$0xff] }
  0x40   :  { %445 = vmatpush1.bf16.msra.mxu1 %v444_v17  ;;  %v596_v43 = vld [vmem:[#allocation2] sm:$0xff]  ;;  %v466_v57 = vpack.c.bf16 %v91_v55, %v85_v54  ;;  %v97_v60 = vld [vmem:[#allocation5 + $0x1a8] sm:$0xff]  ;;  %v103_v61 = vld [vmem:[#allocation5 + $0x1d8] sm:$0xff] }
  0x41   :  { %447 = vmatprep.subr.bf16.mxu1 %v446_v21  ;;  %417 = vmatpush1.bf16.msra.mxu0 %v416_v24  ;;  %v90_v59 = vld [vmem:[#allocation5 + $0x170] sm:$0xff]  ;;  %v96_v63 = vld [vmem:[#allocation5 + $0x1a0] sm:$0xff]  ;;  %v109_v2 = vld [vmem:[#allocation5 + $0x208] sm:$0xff] }
  0x42   :  { %419 = vmatprep.subr.bf16.mxu0 %v418_v27  ;;  %v468_v62 = vpack.c.bf16 %v90_v59, %v84_v58  ;;  %v102_v1 = vld [vmem:[#allocation5 + $0x1d0] sm:$0xff]  ;;  %v115_v3 = vld [vmem:[#allocation5 + $0x238] sm:$0xff]  ;;  %v108_v6 = vld [vmem:[#allocation5 + $0x200] sm:$0xff] }
  0x43   :  { %v472_v4 = vpack.c.bf16 %v102_v1, %v96_v63  ;;  %v474_v5 = vpack.c.bf16 %v115_v3, %v109_v2  ;;  %v114_v7 = vld [vmem:[#allocation5 + $0x230] sm:$0xff]  ;;  %v121_v8 = vld [vmem:[#allocation5 + $0x268] sm:$0xff]  ;;  %v127_v9 = vld [vmem:[#allocation5 + $0x298] sm:$0xff] }
  0x44   :  { %449 = vmatpush1.bf16.msra.mxu1 %v448_v30  ;;  %v476_v10 = vpack.c.bf16 %v114_v7, %v108_v6  ;;  %v478_v11 = vpack.c.bf16 %v127_v9, %v121_v8  ;;  %v120_v12 = vld [vmem:[#allocation5 + $0x260] sm:$0xff]  ;;  %v126_v13 = vld [vmem:[#allocation5 + $0x290] sm:$0xff]  ;;  %v133_v14 = vld [vmem:[#allocation5 + $0x2c8] sm:$0xff] }
  0x45   :  { %451 = vmatprep.subr.bf16.mxu1 %v450_v33  ;;  %421 = vmatpush1.bf16.msra.mxu0 %v420_v36  ;;  %v139_v15 = vld [vmem:[#allocation5 + $0x2f8] sm:$0xff]  ;;  %v480_v16 = vpack.c.bf16 %v126_v13, %v120_v12  ;;  %v132_v18 = vld [vmem:[#allocation5 + $0x2c0] sm:$0xff]  ;;  %v138_v19 = vld [vmem:[#allocation5 + $0x2f0] sm:$0xff] }
  0x46   :  { %455 = vmatprep.subr.bf16.mxu0 %v454_v37  ;;  %v482_v17 = vpack.c.bf16 %v139_v15, %v133_v14  ;;  %v484_v20 = vpack.c.bf16 %v138_v19, %v132_v18 }
  0x48   :  { %453 = vmatpush1.bf16.msra.mxu1 %v452_v40  ;;  %205 = vmatmul.mubr.f32.vlgmr.msra.gmra.mrb[0].mxu0 %v596_v43 }
  0x49   :  { %457 = vmatpush1.bf16.msra.mxu0 %v456_v44  ;;  %346 = vmatprep.mubr.f32.mxu0 %v544_v0  ;;  %v470_v0 = vpack.c.bf16 %v103_v61, %v97_v60 }
  0x4a   :  { %459 = vmatprep.subr.bf16.mxu0 %v458_v45 }
  0x4b   :  { %276 = vmatmul.mubr.f32.vlgmr.msra.gmra.mrb[0].mxu1 %v596_v43 }
  0x4d   :  { %461 = vmatpush1.bf16.msra.mxu0 %v460_v50 }
  0x4e   :  { %463 = vmatprep.subr.bf16.mxu0 %v462_v51 }
  0x51   :  { %465 = vmatpush1.bf16.msra.mxu0 %v464_v56 }
  0x52   :  { %467 = vmatprep.subr.bf16.mxu0 %v466_v57 }
  0x55   :  { %469 = vmatpush1.bf16.msra.mxu0 %v468_v62 }
  0x56   :  { %471 = vmatprep.subr.bf16.mxu0 %v470_v0 }
  0x59   :  { %473 = vmatpush1.bf16.msra.mxu0 %v472_v4 }
  0x5a   :  { %475 = vmatprep.subr.bf16.mxu0 %v474_v5 }
  0x5d   :  { %477 = vmatpush1.bf16.msra.mxu0 %v476_v10 }
  0x5e   :  { %479 = vmatprep.subr.bf16.mxu0 %v478_v11 }
  0x61   :  { %481 = vmatpush1.bf16.msra.mxu0 %v480_v16 }
  0x62   :  { %483 = vmatprep.subr.bf16.mxu0 %v482_v17 }
  0x65   :  { %485 = vmatpush1.bf16.msra.mxu0 %v484_v20 }
  0x68   :  { %347 = vmatmul.mubr.f32.vlgmr.msra.gmra.mrb[2].mxu0 %v596_v43 }
 0x11b   :  { %v206_v21 = vpop.f32.mrb[0].mxu0 }
 0x11c   :  { %v208_v22 = vpop.f32.mrb[1].mxu0  ;;  %v353_v23 = vmul.f32 %v206_v21, %v596_v43 }
 0x11d   :  { %v357_v27 = vmul.f32 %v208_v22, %v596_v43 }
 0x11e   :  { %v277_v24 = vpop.f32.mrb[0].mxu1  ;;  %354 = vadd.xlane.f32.xlu0 %v353_v23 }
 0x11f   :  { %v362_v25 = vmul.f32 %v277_v24, %v596_v43  ;;  %v279_v26 = vpop.f32.mrb[1].mxu1 }
 0x120   :  { %v367_v28 = vmul.f32 %v279_v26, %v596_v43 }
 0x121   :  { %363 = vadd.xlane.f32.xlu1 %v362_v25 }
 0x122   :  { %358 = vadd.xlane.f32.xlu0 %v357_v27 }
 0x125   :  { %368 = vadd.xlane.f32.xlu1 %v367_v28 }
 0x13b   :  { %v348_v29 = vpop.f32.mrb[2].mxu0 }
 0x13c   :  { %v372_v30 = vmul.f32 %v348_v29, %v596_v43  ;;  %v350_v31 = vpop.f32.mrb[3].mxu0 }
 0x13d   :  { %v377_v32 = vmul.f32 %v350_v31, %v596_v43 }
 0x13e   :  { %373 = vadd.xlane.f32.xlu0 %v372_v30 }
 0x13f   :  { %378 = vadd.xlane.f32.xlu1 %v377_v32 }
 0x1ab   :  { %v355_v33 = vpop.xlane.xlu0 %354 }
 0x1ac   :  { %v356_v37 = vmul.f32 0.5, %v355_v33 }
 0x1ae   :  { %v364_v35 = vpop.xlane.xlu1 %363 }
 0x1af   :  { %v359_v34 = vpop.xlane.xlu0 %358  ;;  %v365_v38 = vmul.f32 0.5, %v364_v35 }
 0x1b0   :  { %v360_v36 = vmul.f32 0.5, %v359_v34 }
 0x1b2   :  { %v361_v39 = vmin.f32 %v356_v37, %v360_v36  ;;  %v369_v40 = vpop.xlane.xlu1 %368 }
 0x1b3   :  { %v370_v42 = vmul.f32 0.5, %v369_v40 }
 0x1b4   :  { %v366_v41 = vmin.f32 %v361_v39, %v365_v38 }
 0x1b6   :  { %v371_v45 = vmin.f32 %v366_v41, %v370_v42 }
 0x1cb   :  { %v374_v44 = vpop.xlane.xlu0 %373 }
 0x1cc   :  { %v375_v46 = vmul.f32 0.5, %v374_v44  ;;  %v379_v47 = vpop.xlane.xlu1 %378 }
 0x1cd   :  { %v380_v48 = vmul.f32 0.5, %v379_v47 }
 0x1ce   :  { %v376_v49 = vmin.f32 %v371_v45, %v375_v46 }
 0x1d0   :  { %v381_v43 = vmin.f32 %v376_v49, %v380_v48 }
 0x1d2   :  { %383 = vst.msk [vmem:[%s613_s2] sm:$0xff] %vm382_vm2, %v381_v43 }
 0x1d3   :  { %388 = vsyncpa [#allocation4], 1 }
 0x1d4   :  { %389 = vsyncpa [#allocation6], 1 }

</bundles_post_ra>
